<compile_context>
chip_gen: v6e
topology: v6e:2x2x1
jax: 0.10.0
libtpu: 0.0.40
codegen_flags: <defaults>
</compile_context>

<pallas_src>
import functools
import math

import jax
import jax.numpy as jnp
from jax import lax
from jax.experimental import pallas as pl
from jax.experimental.pallas import tpu as pltpu


def _self_attention_kernel(x_ref, pad_ref, wqkv_ref, wu_ref, bu_ref, o_ref,
                           attn_ref, *, heads, head_size):
    # x_ref:    (Bb, T, K)   block of Bb batch elements
    # pad_ref:  (Bb, 1, T)   key-padding mask (0 == padded key), f32
    # wqkv_ref: (K, 3K)      [Wq^T * scale | Wk^T | Wv^T], x.dtype
    # wu_ref:   (K, K)       Wu^T, x.dtype
    # bu_ref:   (1, K)       unify bias, f32
    # o_ref:    (Bb, T, K)
    # attn_ref: (Bb*T, K)    VMEM scratch: concatenated head outputs, x.dtype
    bb, t, k = x_ref.shape
    hs = head_size
    bt = bb * t
    in_dtype = x_ref.dtype

    # --- fused QKV projection: one wide MXU matmul, f32 accumulation ---------
    x2 = x_ref[...].reshape(bt, k)
    qkv = jnp.dot(x2, wqkv_ref[...], preferred_element_type=jnp.float32)
    qkv = qkv.astype(in_dtype).reshape(bb, t, 3 * k)   # feed MXU in input dtype

    # --- combined key-padding + causal mask (bool, shared by all heads) ------
    pad_mask = pad_ref[...] == 0                                # (Bb, 1, T)
    row = lax.broadcasted_iota(jnp.int32, (t, t), 0)
    col = lax.broadcasted_iota(jnp.int32, (t, t), 1)
    causal = (col > row)[None]                                  # (1, T, T)
    neg_mask = pad_mask | causal                                # (Bb, T, T)

    # --- per-head attention (static, unrolled loop) ---------------------------
    for h in range(heads):
        qh = qkv[:, :, h * hs:(h + 1) * hs]                     # scale pre-folded
        kh = qkv[:, :, k + h * hs:k + (h + 1) * hs]
        vh = qkv[:, :, 2 * k + h * hs:2 * k + (h + 1) * hs]

        s = jnp.einsum("btd,bsd->bts", qh, kh,
                       preferred_element_type=jnp.float32)      # (Bb, T, T) f32
        # Large finite negative instead of -inf: fully padded rows become
        # uniform instead of NaN.
        s = jnp.where(neg_mask, jnp.float32(-1e30), s)
        m = jnp.max(s, axis=-1, keepdims=True)                  # f32 softmax stats
        e = jnp.exp(s - m)
        denom = jnp.sum(e, axis=-1, keepdims=True)
        w = (e * pl.reciprocal(denom, approx=True)).astype(in_dtype)

        attn = jnp.einsum("bts,bsd->btd", w, vh,
                          preferred_element_type=jnp.float32)   # (Bb, T, hs)
        attn_ref[:, h * hs:(h + 1) * hs] = attn.reshape(bt, hs).astype(in_dtype)

    # --- single K-deep unify matmul over all heads at once --------------------
    y = jnp.dot(attn_ref[...], wu_ref[...], preferred_element_type=jnp.float32)
    y = y + bu_ref[...].astype(jnp.float32)
    o_ref[...] = y.reshape(bb, t, k).astype(o_ref.dtype)


def _pick_block_b(b, t, k, itemsize, *, vmem_budget=32 * 1024 * 1024,
                  target_rows=512):
    """Largest divisor of b whose working set fits `vmem_budget`, targeting
    ~target_rows rows per grid step, capped so the grid has >= 2 steps when
    b >= 2 (v7x has 2 TensorCores per chip)."""
    def est_bytes(bb):
        rows = bb * t
        io = 2 * 2 * bb * t * k * itemsize              # double-buffered x + out
        pad = 2 * bb * t * 4                            # padding block (f32)
        wts = 4 * k * k * itemsize + 4 * k              # single-buffered weights
        qkv = rows * 3 * k * (4 + itemsize)             # f32 proj + in-dtype copy
        scr = 2 * bb * t * t * 4 + bb * t * t           # scores + exp (f32), mask
        attn = rows * k * itemsize                      # unify-input scratch
        return io + pad + wts + qkv + scr + attn

    best = 1
    for d in range(1, b + 1):
        if b % d:
            continue
        if d > 1 and t % 8:
            continue      # keep the in-kernel (Bb,T,K)<->(Bb*T,K) reshapes tile-aligned
        if d * t > max(target_rows, t):
            continue
        if est_bytes(d) > vmem_budget:
            continue
        best = d
    if b >= 2:            # ensure >= 2 grid steps so both v7x TensorCores get work
        best = min(best, b // 2)
        while b % best:
            best -= 1
    return max(best, 1)


def self_attention_gen(x, padding, params, *, heads):
    """Pallas forward pass matching SelfAttentionGen.forward(x, padding)."""
    b, t, k = x.shape
    assert k % heads == 0
    head_size = k // heads
    scale = 1.0 / math.sqrt(head_size)

    if padding is None:
        padding = jnp.ones((b, t), dtype=jnp.float32)
    padding = padding.reshape(b, 1, t).astype(jnp.float32)

    # PyTorch Linear stores W as (out, in) and computes x @ W.T.
    # Fuse Q/K/V into one (K, 3K) weight; fold the 1/sqrt(hs) scale into Wq.
    w_qkv = jnp.concatenate(
        [params["wq"].T * scale, params["wk"].T, params["wv"].T],
        axis=1).astype(x.dtype)                                  # (K, 3K)
    wu = params["wu"].T.astype(x.dtype)                          # (K, K)
    bu = params["bu"].reshape(1, k).astype(jnp.float32)          # (1, K)

    itemsize = jnp.dtype(x.dtype).itemsize
    block_b = _pick_block_b(b, t, k, itemsize)

    kernel = functools.partial(_self_attention_kernel,
                               heads=heads, head_size=head_size)

    const = pl.Buffered(1)   # weights/bias fetched once -> no double buffering
    grid_spec = pltpu.PrefetchScalarGridSpec(
        num_scalar_prefetch=0,
        grid=(b // block_b,),
        in_specs=[
            pl.BlockSpec((block_b, t, k), lambda i: (i, 0, 0)),              # x
            pl.BlockSpec((block_b, 1, t), lambda i: (i, 0, 0)),              # padding
            pl.BlockSpec((k, 3 * k), lambda i: (0, 0), pipeline_mode=const),  # Wqkv
            pl.BlockSpec((k, k), lambda i: (0, 0), pipeline_mode=const),      # Wu^T
            pl.BlockSpec((1, k), lambda i: (0, 0), pipeline_mode=const),      # bu
        ],
        out_specs=pl.BlockSpec((block_b, t, k), lambda i: (i, 0, 0)),
        scratch_shapes=[pltpu.VMEM((block_b * t, k), x.dtype)],
    )

    return pl.pallas_call(
        kernel,
        out_shape=jax.ShapeDtypeStruct((b, t, k), x.dtype),
        grid_spec=grid_spec,
        compiler_params=pltpu.CompilerParams(
            dimension_semantics=("parallel",),
            vmem_limit_bytes=64 * 1024 * 1024),
    )(x, padding, w_qkv, wu, bu)


def self_attention_gen_ref(x, padding, params, *, heads):
    """Pure-JAX reference mirroring the PyTorch forward exactly."""
    b, t, k = x.shape
    hs = k // heads
    q = x @ params["wq"].T
    ky = x @ params["wk"].T
    v = x @ params["wv"].T

    def split(z):  # (b, t, k) -> (b, h, t, hs)
        return z.reshape(b, t, heads, hs).transpose(0, 2, 1, 3)

    q, ky, v = split(q), split(ky), split(v)
    raw = jnp.einsum("bhtd,bhsd->bhts", q, ky)
    if padding is not None:
        pad_mask = (padding == 0)[:, None, None, :]          # (b,1,1,t)
        raw = jnp.where(pad_mask, -jnp.inf, raw)
    causal = jnp.triu(jnp.ones((t, t), dtype=bool), k=1)
    raw = jnp.where(causal[None, None], -jnp.inf, raw)
    raw = raw / math.sqrt(hs)
    w = jax.nn.softmax(raw, axis=-1)
    out = jnp.einsum("bhts,bhsd->bhtd", w, v)
    out = out.transpose(0, 2, 1, 3).reshape(b, t, k)
    return out @ params["wu"].T + params["bu"]


if __name__ == "__main__":
    B, T, K, HEADS = 2, 8, 32, 4

    key = jax.random.PRNGKey(0)
    k_x, k_wq, k_wk, k_wv, k_wu, k_bu = jax.random.split(key, 6)

    x = jax.random.normal(k_x, (B, T, K), dtype=jnp.float32)

    # Key-padding mask: 1 = valid, 0 = padded (leading tokens always valid so
    # no attention row is fully masked — matches PyTorch semantics exactly).
    padding = jnp.array(
        [[1, 1, 1, 1, 1, 1, 1, 0],
         [1, 1, 1, 1, 1, 0, 0, 0]], dtype=jnp.float32)

    # Deterministic parameter init (PyTorch Linear shapes: (out, in)).
    bound = 1.0 / math.sqrt(K)
    params = {
        "wq": jax.random.uniform(k_wq, (K, K), jnp.float32, -bound, bound),
        "wk": jax.random.uniform(k_wk, (K, K), jnp.float32, -bound, bound),
        "wv": jax.random.uniform(k_wv, (K, K), jnp.float32, -bound, bound),
        "wu": jax.random.uniform(k_wu, (K, K), jnp.float32, -bound, bound),
        "bu": jax.random.uniform(k_bu, (K,), jnp.float32, -bound, bound),
    }

    out = self_attention_gen(x, padding, params, heads=HEADS)
    out = jax.block_until_ready(out)

    ref = self_attention_gen_ref(x, padding, params, heads=HEADS)
    assert out.shape == (B, T, K)
    # Tolerance relaxed vs. exact-divide version because softmax normalization
    # uses the hardware approx reciprocal (rel. err ~2^-12).
    assert jnp.allclose(out, ref, atol=2e-3, rtol=2e-3), "mismatch vs reference"

    print("KERNEL_OK")
</pallas_src>

<mosaic_0001>
module attributes {stable_mosaic.version = 11 : i64} {
  func.func @_self_attention_kernel(%arg0: i32, %arg1: memref<1x8x32xf32, #tpu.memory_space<vmem>>, %arg2: memref<1x1x8xf32, #tpu.memory_space<vmem>>, %arg3: memref<32x96xf32, #tpu.memory_space<vmem>>, %arg4: memref<32x32xf32, #tpu.memory_space<vmem>>, %arg5: memref<1x32xf32, #tpu.memory_space<vmem>>, %arg6: memref<1x8x32xf32, #tpu.memory_space<vmem>>, %arg7: memref<8x32xf32, #tpu.memory_space<vmem>>) attributes {dimension_semantics = [#tpu.dimension_semantics<parallel>], iteration_bounds = array<i64: 2>, scalar_prefetch = 0 : i64, scratch_operands = 1 : i64, tpu.core_type = #tpu.core_type<tc>, window_params = [{transform_indices = @transform_0, window_bounds = array<i64: 1, 8, 32>}, {transform_indices = @transform_1, window_bounds = array<i64: 1, 1, 8>}, {pipeline_mode = #tpu.pipeline_mode<synchronous>, transform_indices = @transform_2, window_bounds = array<i64: 32, 96>}, {pipeline_mode = #tpu.pipeline_mode<synchronous>, transform_indices = @transform_3, window_bounds = array<i64: 32, 32>}, {pipeline_mode = #tpu.pipeline_mode<synchronous>, transform_indices = @transform_4, window_bounds = array<i64: 1, 32>}, {transform_indices = @transform_5, window_bounds = array<i64: 1, 8, 32>}]} {
    %c0 = arith.constant 0 : index
    %c0_0 = arith.constant 0 : index
    %c0_1 = arith.constant 0 : index
    %0 = vector.load %arg1[%c0, %c0_0, %c0_1] : memref<1x8x32xf32, #tpu.memory_space<vmem>>, vector<1x8x32xf32>
    %1 = vector.shape_cast %0 : vector<1x8x32xf32> to vector<8x32xf32>
    %c0_2 = arith.constant 0 : index
    %c0_3 = arith.constant 0 : index
    %2 = vector.load %arg3[%c0_2, %c0_3] : memref<32x96xf32, #tpu.memory_space<vmem>>, vector<32x96xf32>
    %cst = arith.constant dense<0.000000e+00> : vector<8x96xf32>
    %3 = tpu.matmul %1, %2, %cst {dimension_numbers = #tpu.dot_dimension_numbers<[1], [0], [0], [1], [0, 0, 1, 1], [], []>} : vector<8x32xf32>, vector<32x96xf32>, vector<8x96xf32> -> vector<8x96xf32>
    %4 = vector.shape_cast %3 : vector<8x96xf32> to vector<1x8x96xf32>
    %c0_4 = arith.constant 0 : index
    %c0_5 = arith.constant 0 : index
    %c0_6 = arith.constant 0 : index
    %5 = vector.load %arg2[%c0_4, %c0_5, %c0_6] : memref<1x1x8xf32, #tpu.memory_space<vmem>>, vector<1x1x8xf32>
    %cst_7 = arith.constant 0.000000e+00 : f32
    %6 = vector.broadcast %cst_7 : f32 to vector<1x1x8xf32>
    %7 = arith.cmpf oeq, %5, %6 : vector<1x1x8xf32>
    %8 = tpu.iota {dimensions = array<i32: 0>} : vector<8x8xi32>
    %9 = tpu.iota {dimensions = array<i32: 1>} : vector<8x8xi32>
    %10 = arith.cmpi sgt, %9, %8 : vector<8x8xi32>
    %11 = vector.shape_cast %10 : vector<8x8xi1> to vector<1x8x8xi1>
    %12 = vector.broadcast %7 : vector<1x1x8xi1> to vector<1x8x8xi1>
    %13 = arith.ori %12, %11 : vector<1x8x8xi1>
    %14 = vector.extract_strided_slice %4 {offsets = [0, 0, 0], sizes = [1, 8, 8], strides = [1, 1, 1]} : vector<1x8x96xf32> to vector<1x8x8xf32>
    %15 = vector.extract_strided_slice %4 {offsets = [0, 0, 32], sizes = [1, 8, 8], strides = [1, 1, 1]} : vector<1x8x96xf32> to vector<1x8x8xf32>
    %16 = vector.extract_strided_slice %4 {offsets = [0, 0, 64], sizes = [1, 8, 8], strides = [1, 1, 1]} : vector<1x8x96xf32> to vector<1x8x8xf32>
    "tpu.trace_start"() <{level = 10 : i32, message = "btd,bsd->bts"}> : () -> ()
    %cst_8 = arith.constant dense<0.000000e+00> : vector<1x8x8xf32>
    %17 = tpu.matmul %14, %15, %cst_8 {dimension_numbers = #tpu.dot_dimension_numbers<[2], [2], [1], [1], [0, 0, 0, 1, 1, 1], [0], [0]>} : vector<1x8x8xf32>, vector<1x8x8xf32>, vector<1x8x8xf32> -> vector<1x8x8xf32>
    %cst_9 = arith.constant -1.000000e+30 : f32
    "tpu.trace_stop"() : () -> ()
    %18 = vector.broadcast %cst_9 : f32 to vector<1x8x8xf32>
    %19 = arith.select %13, %18, %17 : vector<1x8x8xi1>, vector<1x8x8xf32>
    %cst_10 = arith.constant dense<0xFF800000> : vector<1x8xf32>
    %20 = vector.multi_reduction <maximumf>, %19, %cst_10 [2] : vector<1x8x8xf32> to vector<1x8xf32>
    %21 = vector.shape_cast %20 : vector<1x8xf32> to vector<1x8x1xf32>
    %22 = vector.broadcast %21 : vector<1x8x1xf32> to vector<1x8x8xf32>
    %23 = arith.subf %19, %22 : vector<1x8x8xf32>
    %24 = math.exp %23 : vector<1x8x8xf32>
    %cst_11 = arith.constant dense<0.000000e+00> : vector<1x8xf32>
    %25 = vector.multi_reduction <add>, %24, %cst_11 [2] : vector<1x8x8xf32> to vector<1x8xf32>
    %26 = vector.shape_cast %25 : vector<1x8xf32> to vector<1x8x1xf32>
    %27 = tpu.reciprocal %26 {approx = true} : vector<1x8x1xf32> -> vector<1x8x1xf32>
    %28 = vector.broadcast %27 : vector<1x8x1xf32> to vector<1x8x8xf32>
    %29 = arith.mulf %24, %28 : vector<1x8x8xf32>
    "tpu.trace_start"() <{level = 10 : i32, message = "bts,bsd->btd"}> : () -> ()
    %cst_12 = arith.constant dense<0.000000e+00> : vector<1x8x8xf32>
    %30 = tpu.matmul %29, %16, %cst_12 {dimension_numbers = #tpu.dot_dimension_numbers<[2], [1], [1], [2], [0, 0, 0, 1, 1, 2], [0], [0]>} : vector<1x8x8xf32>, vector<1x8x8xf32>, vector<1x8x8xf32> -> vector<1x8x8xf32>
    "tpu.trace_stop"() : () -> ()
    %31 = vector.shape_cast %30 : vector<1x8x8xf32> to vector<8x8xf32>
    %c0_13 = arith.constant 0 : index
    %c0_14 = arith.constant 0 : index
    %32 = vector.load %arg7[%c0_13, %c0_14] : memref<8x32xf32, #tpu.memory_space<vmem>>, vector<8x8xf32>
    tpu.vector_store %arg7[%c0_13, %c0_14], %31 {strides = array<i32>} : memref<8x32xf32, #tpu.memory_space<vmem>>, vector<8x8xf32>,
    %33 = vector.extract_strided_slice %4 {offsets = [0, 0, 8], sizes = [1, 8, 8], strides = [1, 1, 1]} : vector<1x8x96xf32> to vector<1x8x8xf32>
    %34 = vector.extract_strided_slice %4 {offsets = [0, 0, 40], sizes = [1, 8, 8], strides = [1, 1, 1]} : vector<1x8x96xf32> to vector<1x8x8xf32>
    %35 = vector.extract_strided_slice %4 {offsets = [0, 0, 72], sizes = [1, 8, 8], strides = [1, 1, 1]} : vector<1x8x96xf32> to vector<1x8x8xf32>
    "tpu.trace_start"() <{level = 10 : i32, message = "btd,bsd->bts"}> : () -> ()
    %cst_15 = arith.constant dense<0.000000e+00> : vector<1x8x8xf32>
    %36 = tpu.matmul %33, %34, %cst_15 {dimension_numbers = #tpu.dot_dimension_numbers<[2], [2], [1], [1], [0, 0, 0, 1, 1, 1], [0], [0]>} : vector<1x8x8xf32>, vector<1x8x8xf32>, vector<1x8x8xf32> -> vector<1x8x8xf32>
    %cst_16 = arith.constant -1.000000e+30 : f32
    "tpu.trace_stop"() : () -> ()
    %37 = vector.broadcast %cst_16 : f32 to vector<1x8x8xf32>
    %38 = arith.select %13, %37, %36 : vector<1x8x8xi1>, vector<1x8x8xf32>
    %cst_17 = arith.constant dense<0xFF800000> : vector<1x8xf32>
    %39 = vector.multi_reduction <maximumf>, %38, %cst_17 [2] : vector<1x8x8xf32> to vector<1x8xf32>
    %40 = vector.shape_cast %39 : vector<1x8xf32> to vector<1x8x1xf32>
    %41 = vector.broadcast %40 : vector<1x8x1xf32> to vector<1x8x8xf32>
    %42 = arith.subf %38, %41 : vector<1x8x8xf32>
    %43 = math.exp %42 : vector<1x8x8xf32>
    %cst_18 = arith.constant dense<0.000000e+00> : vector<1x8xf32>
    %44 = vector.multi_reduction <add>, %43, %cst_18 [2] : vector<1x8x8xf32> to vector<1x8xf32>
    %45 = vector.shape_cast %44 : vector<1x8xf32> to vector<1x8x1xf32>
    %46 = tpu.reciprocal %45 {approx = true} : vector<1x8x1xf32> -> vector<1x8x1xf32>
    %47 = vector.broadcast %46 : vector<1x8x1xf32> to vector<1x8x8xf32>
    %48 = arith.mulf %43, %47 : vector<1x8x8xf32>
    "tpu.trace_start"() <{level = 10 : i32, message = "bts,bsd->btd"}> : () -> ()
    %cst_19 = arith.constant dense<0.000000e+00> : vector<1x8x8xf32>
    %49 = tpu.matmul %48, %35, %cst_19 {dimension_numbers = #tpu.dot_dimension_numbers<[2], [1], [1], [2], [0, 0, 0, 1, 1, 2], [0], [0]>} : vector<1x8x8xf32>, vector<1x8x8xf32>, vector<1x8x8xf32> -> vector<1x8x8xf32>
    "tpu.trace_stop"() : () -> ()
    %50 = vector.shape_cast %49 : vector<1x8x8xf32> to vector<8x8xf32>
    %c0_20 = arith.constant 0 : index
    %c8 = arith.constant 8 : index
    %51 = vector.load %arg7[%c0_20, %c8] : memref<8x32xf32, #tpu.memory_space<vmem>>, vector<8x8xf32>
    tpu.vector_store %arg7[%c0_20, %c8], %50 {strides = array<i32>} : memref<8x32xf32, #tpu.memory_space<vmem>>, vector<8x8xf32>,
    %52 = vector.extract_strided_slice %4 {offsets = [0, 0, 16], sizes = [1, 8, 8], strides = [1, 1, 1]} : vector<1x8x96xf32> to vector<1x8x8xf32>
    %53 = vector.extract_strided_slice %4 {offsets = [0, 0, 48], sizes = [1, 8, 8], strides = [1, 1, 1]} : vector<1x8x96xf32> to vector<1x8x8xf32>
    %54 = vector.extract_strided_slice %4 {offsets = [0, 0, 80], sizes = [1, 8, 8], strides = [1, 1, 1]} : vector<1x8x96xf32> to vector<1x8x8xf32>
    "tpu.trace_start"() <{level = 10 : i32, message = "btd,bsd->bts"}> : () -> ()
    %cst_21 = arith.constant dense<0.000000e+00> : vector<1x8x8xf32>
    %55 = tpu.matmul %52, %53, %cst_21 {dimension_numbers = #tpu.dot_dimension_numbers<[2], [2], [1], [1], [0, 0, 0, 1, 1, 1], [0], [0]>} : vector<1x8x8xf32>, vector<1x8x8xf32>, vector<1x8x8xf32> -> vector<1x8x8xf32>
    %cst_22 = arith.constant -1.000000e+30 : f32
    "tpu.trace_stop"() : () -> ()
    %56 = vector.broadcast %cst_22 : f32 to vector<1x8x8xf32>
    %57 = arith.select %13, %56, %55 : vector<1x8x8xi1>, vector<1x8x8xf32>
    %cst_23 = arith.constant dense<0xFF800000> : vector<1x8xf32>
    %58 = vector.multi_reduction <maximumf>, %57, %cst_23 [2] : vector<1x8x8xf32> to vector<1x8xf32>
    %59 = vector.shape_cast %58 : vector<1x8xf32> to vector<1x8x1xf32>
    %60 = vector.broadcast %59 : vector<1x8x1xf32> to vector<1x8x8xf32>
    %61 = arith.subf %57, %60 : vector<1x8x8xf32>
    %62 = math.exp %61 : vector<1x8x8xf32>
    %cst_24 = arith.constant dense<0.000000e+00> : vector<1x8xf32>
    %63 = vector.multi_reduction <add>, %62, %cst_24 [2] : vector<1x8x8xf32> to vector<1x8xf32>
    %64 = vector.shape_cast %63 : vector<1x8xf32> to vector<1x8x1xf32>
    %65 = tpu.reciprocal %64 {approx = true} : vector<1x8x1xf32> -> vector<1x8x1xf32>
    %66 = vector.broadcast %65 : vector<1x8x1xf32> to vector<1x8x8xf32>
    %67 = arith.mulf %62, %66 : vector<1x8x8xf32>
    "tpu.trace_start"() <{level = 10 : i32, message = "bts,bsd->btd"}> : () -> ()
    %cst_25 = arith.constant dense<0.000000e+00> : vector<1x8x8xf32>
    %68 = tpu.matmul %67, %54, %cst_25 {dimension_numbers = #tpu.dot_dimension_numbers<[2], [1], [1], [2], [0, 0, 0, 1, 1, 2], [0], [0]>} : vector<1x8x8xf32>, vector<1x8x8xf32>, vector<1x8x8xf32> -> vector<1x8x8xf32>
    "tpu.trace_stop"() : () -> ()
    %69 = vector.shape_cast %68 : vector<1x8x8xf32> to vector<8x8xf32>
    %c0_26 = arith.constant 0 : index
    %c16 = arith.constant 16 : index
    %70 = vector.load %arg7[%c0_26, %c16] : memref<8x32xf32, #tpu.memory_space<vmem>>, vector<8x8xf32>
    tpu.vector_store %arg7[%c0_26, %c16], %69 {strides = array<i32>} : memref<8x32xf32, #tpu.memory_space<vmem>>, vector<8x8xf32>,
    %71 = vector.extract_strided_slice %4 {offsets = [0, 0, 24], sizes = [1, 8, 8], strides = [1, 1, 1]} : vector<1x8x96xf32> to vector<1x8x8xf32>
    %72 = vector.extract_strided_slice %4 {offsets = [0, 0, 56], sizes = [1, 8, 8], strides = [1, 1, 1]} : vector<1x8x96xf32> to vector<1x8x8xf32>
    %73 = vector.extract_strided_slice %4 {offsets = [0, 0, 88], sizes = [1, 8, 8], strides = [1, 1, 1]} : vector<1x8x96xf32> to vector<1x8x8xf32>
    "tpu.trace_start"() <{level = 10 : i32, message = "btd,bsd->bts"}> : () -> ()
    %cst_27 = arith.constant dense<0.000000e+00> : vector<1x8x8xf32>
    %74 = tpu.matmul %71, %72, %cst_27 {dimension_numbers = #tpu.dot_dimension_numbers<[2], [2], [1], [1], [0, 0, 0, 1, 1, 1], [0], [0]>} : vector<1x8x8xf32>, vector<1x8x8xf32>, vector<1x8x8xf32> -> vector<1x8x8xf32>
    %cst_28 = arith.constant -1.000000e+30 : f32
    "tpu.trace_stop"() : () -> ()
    %75 = vector.broadcast %cst_28 : f32 to vector<1x8x8xf32>
    %76 = arith.select %13, %75, %74 : vector<1x8x8xi1>, vector<1x8x8xf32>
    %cst_29 = arith.constant dense<0xFF800000> : vector<1x8xf32>
    %77 = vector.multi_reduction <maximumf>, %76, %cst_29 [2] : vector<1x8x8xf32> to vector<1x8xf32>
    %78 = vector.shape_cast %77 : vector<1x8xf32> to vector<1x8x1xf32>
    %79 = vector.broadcast %78 : vector<1x8x1xf32> to vector<1x8x8xf32>
    %80 = arith.subf %76, %79 : vector<1x8x8xf32>
    %81 = math.exp %80 : vector<1x8x8xf32>
    %cst_30 = arith.constant dense<0.000000e+00> : vector<1x8xf32>
    %82 = vector.multi_reduction <add>, %81, %cst_30 [2] : vector<1x8x8xf32> to vector<1x8xf32>
    %83 = vector.shape_cast %82 : vector<1x8xf32> to vector<1x8x1xf32>
    %84 = tpu.reciprocal %83 {approx = true} : vector<1x8x1xf32> -> vector<1x8x1xf32>
    %85 = vector.broadcast %84 : vector<1x8x1xf32> to vector<1x8x8xf32>
    %86 = arith.mulf %81, %85 : vector<1x8x8xf32>
    "tpu.trace_start"() <{level = 10 : i32, message = "bts,bsd->btd"}> : () -> ()
    %cst_31 = arith.constant dense<0.000000e+00> : vector<1x8x8xf32>
    %87 = tpu.matmul %86, %73, %cst_31 {dimension_numbers = #tpu.dot_dimension_numbers<[2], [1], [1], [2], [0, 0, 0, 1, 1, 2], [0], [0]>} : vector<1x8x8xf32>, vector<1x8x8xf32>, vector<1x8x8xf32> -> vector<1x8x8xf32>
    "tpu.trace_stop"() : () -> ()
    %88 = vector.shape_cast %87 : vector<1x8x8xf32> to vector<8x8xf32>
    %c0_32 = arith.constant 0 : index
    %c24 = arith.constant 24 : index
    %89 = vector.load %arg7[%c0_32, %c24] : memref<8x32xf32, #tpu.memory_space<vmem>>, vector<8x8xf32>
    tpu.vector_store %arg7[%c0_32, %c24], %88 {strides = array<i32>} : memref<8x32xf32, #tpu.memory_space<vmem>>, vector<8x8xf32>,
    %c0_33 = arith.constant 0 : index
    %c0_34 = arith.constant 0 : index
    %90 = vector.load %arg7[%c0_33, %c0_34] : memref<8x32xf32, #tpu.memory_space<vmem>>, vector<8x32xf32>
    %c0_35 = arith.constant 0 : index
    %c0_36 = arith.constant 0 : index
    %91 = vector.load %arg4[%c0_35, %c0_36] : memref<32x32xf32, #tpu.memory_space<vmem>>, vector<32x32xf32>
    %cst_37 = arith.constant dense<0.000000e+00> : vector<8x32xf32>
    %92 = tpu.matmul %90, %91, %cst_37 {dimension_numbers = #tpu.dot_dimension_numbers<[1], [0], [0], [1], [0, 0, 1, 1], [], []>} : vector<8x32xf32>, vector<32x32xf32>, vector<8x32xf32> -> vector<8x32xf32>
    %c0_38 = arith.constant 0 : index
    %c0_39 = arith.constant 0 : index
    %93 = vector.load %arg5[%c0_38, %c0_39] : memref<1x32xf32, #tpu.memory_space<vmem>>, vector<1x32xf32>
    %94 = vector.broadcast %93 : vector<1x32xf32> to vector<8x32xf32>
    %95 = arith.addf %92, %94 : vector<8x32xf32>
    %96 = vector.shape_cast %95 : vector<8x32xf32> to vector<1x8x32xf32>
    %c0_40 = arith.constant 0 : index
    %c0_41 = arith.constant 0 : index
    %c0_42 = arith.constant 0 : index
    %97 = vector.load %arg6[%c0_40, %c0_41, %c0_42] : memref<1x8x32xf32, #tpu.memory_space<vmem>>, vector<1x8x32xf32>
    tpu.vector_store %arg6[%c0_40, %c0_41, %c0_42], %96 {strides = array<i32>} : memref<1x8x32xf32, #tpu.memory_space<vmem>>, vector<1x8x32xf32>,
    return
  }
  func.func @transform_0(%arg0: i32) -> (i32, i32, i32) {
    %c0_i32 = arith.constant 0 : i32
    %c0_i32_0 = arith.constant 0 : i32
    %c0_i32_1 = arith.constant 0 : i32
    return %arg0, %c0_i32, %c0_i32_0 : i32, i32, i32
  }
  func.func @transform_1(%arg0: i32) -> (i32, i32, i32) {
    %c0_i32 = arith.constant 0 : i32
    %c0_i32_0 = arith.constant 0 : i32
    %c0_i32_1 = arith.constant 0 : i32
    return %arg0, %c0_i32, %c0_i32_0 : i32, i32, i32
  }
  func.func @transform_2(%arg0: i32) -> (i32, i32) {
    %c0_i32 = arith.constant 0 : i32
    %c0_i32_0 = arith.constant 0 : i32
    %c0_i32_1 = arith.constant 0 : i32
    return %c0_i32, %c0_i32_0 : i32, i32
  }
  func.func @transform_3(%arg0: i32) -> (i32, i32) {
    %c0_i32 = arith.constant 0 : i32
    %c0_i32_0 = arith.constant 0 : i32
    %c0_i32_1 = arith.constant 0 : i32
    return %c0_i32, %c0_i32_0 : i32, i32
  }
  func.func @transform_4(%arg0: i32) -> (i32, i32) {
    %c0_i32 = arith.constant 0 : i32
    %c0_i32_0 = arith.constant 0 : i32
    %c0_i32_1 = arith.constant 0 : i32
    return %c0_i32, %c0_i32_0 : i32, i32
  }
  func.func @transform_5(%arg0: i32) -> (i32, i32, i32) {
    %c0_i32 = arith.constant 0 : i32
    %c0_i32_0 = arith.constant 0 : i32
    %c0_i32_1 = arith.constant 0 : i32
    return %arg0, %c0_i32, %c0_i32_0 : i32, i32, i32
  }
}

</mosaic_0001>

<bundles_post_ra>
// kernel: tpu_custom_call.1
= control target key start
LH: loop header
LB: loop body
LE: loop exit
PB: predicated region body
PF: predicated region fallthrough
CT: control target
= control target key end

     0   :  { %s2069_s0 = inlined_call_operand.hbm [shape: f32[2,8,32], index: 0, kind: input, shape index: {}]   ;;  %s2070_s1 = inlined_call_operand.hbm [shape: f32[2,1,8], index: 1, kind: input, shape index: {}]   ;;  %s2071_s2 = inlined_call_operand.hbm [shape: f32[32,96], index: 2, kind: input, shape index: {}]   ;;  %s2072_s3 = inlined_call_operand.hbm [shape: f32[32,32], index: 3, kind: input, shape index: {}]   ;;  %s2073_s4 = inlined_call_operand.vmem [shape: f32[1,32], index: 4, kind: input, shape index: {}]   ;;  %s2074_s5 = inlined_call_operand.hbm [shape: f32[2,8,32], index: 5, kind: output, shape index: {}]  }
   0x1   :  { %2079 = sst [smem:[#allocation17_spill]] %s2069_s0 }
   0x2   :  { %2080 = sst [smem:[#allocation18_spill]] %s2071_s2 }
   0x3   :  { %10 = vsyncpa [#allocation4], 0 }
   0x4   :  { %12 = vsyncpa [#allocation4 + $0x1], 0 }
   0x5   :  { %13 = vsyncpa [#allocation7], 0 }
   0x6   :  { %15 = vsyncpa [#allocation7 + $0x1], 0 }
   0x7   :  { %16 = vsyncpa [#allocation10], 0 }
   0x8   :  { %17 = vsyncpa [#allocation5], 0 }
   0x9   :  { %19 = vsyncpa [#allocation5 + $0x1], 0  ;;  %s1755_s18 = smov 0   ;;  %s1757_s19 = smov 0  }
   0xa   :  { %s1759_s20 = smov 0   ;;  %s1761_s21 = smov 0  }
   0xb LB: > { %s1776_s22 = sadd.s32 4294967295, %s1699_s21   ;;  %s1288_s23 = sadd.s32 4294967294, %s1699_s21   ;;  %s1699_s21 = sphi %s1761_s21, %s2104_s21   ;;  %s1695_s20 = sphi %s1759_s20, %s2103_s20   ;;  %s1691_s19 = sphi %s1757_s19, %s2102_s19   ;;  %s1687_s18 = sphi %s1755_s18, %s2101_s18  }
   0xc   : > { %p45_p0 = scmp.ne.s32.totalorder %s1691_s19, %s1687_s18  ;;  %p2075_p1 = scmp.eq.s32.totalorder %s1776_s22, 0 }
   0xd   : > { %p164_p3 = scmp.eq.s32.totalorder %s1288_s23, 1  ;;  %p1289_p5 = scmp.ge.s32.totalorder %s1699_s21, 1 }
   0xe   : > { %p1785_p4 = por %p2075_p1, %p45_p0  ;;  %p171_p7 = scmp.lt.s32.totalorder %s1699_s21, 3 }
   0xf   : > { %p1790_p6 = por %p164_p3, %p45_p0  ;;  %s1701_s27 = smov [#allocation8]  }
  0x10   : > { %s2081_s24 = scalar_select %p1785_p4, 1, 0 }
  0x11   : > { %s2082_s25 = scalar_select %p1790_p6, 1, 0 }
  0x12   : > { %p1795_p8 = pnand %p1289_p5, %p171_p7  ;;  %s183_s28 = sshll.u32 %s1701_s27, 4  ;;  %s184_s28 = int_to_ptr.vmem [resolvable:$true] %s183_s28 }
  0x13   : > { %s1702_s30 = smov [#allocation9]   ;;  %s1526_s7 = scalar_lea.vmem %s184_s28, 512 }
  0x14   : > { %s2083_s26 = scalar_select %p1795_p8, 1, 0 }
  0x15   : > { %p1422_p9 = pneg %p1795_p8  ;;  %s196_s6 = sshll.u32 %s1702_s30, 4  ;;  %s197_s6 = int_to_ptr.vmem [resolvable:$true] %s196_s6 }
  0x16   : > { %p1527_p13 = scmp.ne.s32.totalorder %s184_s28, %s1526_s7  ;;  %p1534_p5 = scmp.lt.s32.totalorder %s184_s28, %s184_s28 }
  0x17   : > { %p1804_p11 = pnand %p1422_p9, %p2075_p1  ;;  %p1535_p7 = scmp.lt.s32.totalorder %s1526_s7, %s1526_s7 }
  0x19   : > { %p1517_p12 = pneg %p1804_p11  ;;  %p1536_p10 = por %p1535_p7, %p1534_p5 }
  0x1b   : > { %p1529_p0 = pnand %p1527_p13, %p1517_p12 }
  0x1d   : > { %p1530_p3 = pneg %p1529_p0 }
  0x1f   : > { %p1537_p9 = pnand %p1536_p10, %p1530_p3 }
  0x21   : > { %1540 = shalt.err (!%p1537_p9)
}
  0x22   : > { %s1703_s8 = smov 128   ;;  %s1704_s9 = smov 8  }
  0x23   : > { %s2085_s2 = sld [smem:[#allocation18_spill]]  ;;  %s1552_s12 = scalar_lea.vmem %s197_s6, 512 }
  0x24   : > { %p1553_p1 = scmp.ne.s32.totalorder %s197_s6, %s1552_s12  ;;  %p1560_p2 = scmp.lt.s32.totalorder %s197_s6, %s197_s6 }
  0x25   : > { %p1561_p6 = scmp.lt.s32.totalorder %s1552_s12, %s1552_s12 }
  0x26   : > { %p1555_p13 = pnand %p1553_p1, %p1517_p12 }
  0x27   : > { %p1562_p5 = por %p1561_p6, %p1560_p2 }
  0x28   : > { %p1556_p0 = pneg %p1555_p13 }
  0x29   : > { %1425 = dma.hbm_to_vmem [thread:$0]  (!%p1804_p11), %s2085_s2, 512, %s184_s28, [#allocation7], %s1703_s8, %s1703_s8, %s1704_s9  }
  0x2a   : > { %p1563_p10 = pnand %p1562_p5, %p1556_p0 }
  0x2c   : > { %1566 = shalt.err (!%p1563_p10)
}
  0x2d   : > { %1428 = dma.hbm_to_vmem [thread:$0]  (!%p1804_p11), %s2072_s3, 512, %s197_s6, [#allocation10], %s1703_s8, %s1703_s8, %s1704_s9  }
  0x2e   : > { %s1827_s15 = sadd.s32 1, %s1699_s21   ;;  %s32_s16 = sadd.s32 1, %s1695_s20 }
  0x2f   : > { %s29_s17 = ssub.s32 %s1699_s21, %s1827_s15  ;;  %p39_p1 = scmp.ne.s32.totalorder %s1695_s20, %s1691_s19 }
  0x30   : > { %p30_p2 = scmp.eq.s32.totalorder %s29_s17, 0  ;;  %p40_p6 = scmp.eq.s32.totalorder %s1699_s21, 0 }
  0x31   : > { %p2086_p12 = scmp.eq.s32.totalorder %s1776_s22, 1  ;;  %p1442_p7 = scmp.lt.s32.totalorder %s1699_s21, 2 }
  0x32   : > { %s1843_s27 = scalar_select %p30_p2, %s1695_s20, %s32_s16  }
  0x33   : > { %p1837_p3 = por %p2086_p12, %p39_p1  ;;  %p41_p9 = por %p40_p6, %p39_p1 }
  0x34   : > { %s1846_s28 = sand.u32 1, %s1695_s20   ;;  %s1294_s30 = sshll.u32 %s1699_s21, 7 }
  0x35   : > { %s2087_s23 = scalar_select %p1837_p3, 1, 0 }
  0x36   : > { %s1293_s29 = sshll.u32 %s1846_s28, 3  ;;  %s2088_s0 = sld [smem:[#allocation17_spill]] }
  0x37   : > { %s217_s9 = scalar_lea.vmem [#allocation3], %s1293_s29  ;;  %p1857_p11 = pnand %p1442_p7, %p41_p9 }
  0x38   : > { %s224_s10 = sshll.u32 %s217_s9, 4  ;;  %s231_s12 = sand.u32 1, %s1699_s21   ;;  %s1855_s10 = int_to_ptr.vmem [resolvable:$true] %s224_s10 }
  0x39   : > { %s214_s13 = scalar_lea.sflag [#allocation4], %s1846_s28  ;;  %p1569_p0 = pneg %p1857_p11 }
  0x3c   : > { %s1853_s8 = scalar_lea.hbm %s2088_s0, %s1294_s30  ;;  %s1572_s29 = scalar_lea.hbm %s2088_s0, 256 }
  0x3d   : > { %s1567_s14 = scalar_lea.hbm %s1853_s8, 128  ;;  %p1573_p1 = scmp.lt.s32.totalorder %s1853_s8, %s2088_s0 }
  0x3e   : > { %p1568_p13 = scmp.ne.s32.totalorder %s1853_s8, %s1567_s14  ;;  %p1574_p2 = scmp.lt.s32.totalorder %s1572_s29, %s1567_s14 }
  0x40   : > { %p1570_p5 = pnand %p1569_p0, %p1568_p13  ;;  %p1575_p6 = por %p1574_p2, %p1573_p1 }
  0x42   : > { %p1571_p10 = pneg %p1570_p5 }
  0x44   : > { %p1576_p12 = pnand %p1575_p6, %p1571_p10 }
  0x46   : > { %1579 = shalt.err (!%p1576_p12)
}
  0x47   : > { %s1580_s7 = scalar_lea.vmem %s1855_s10, 128  ;;  %s1705_s9 = smov [#allocation3]  }
  0x48   : > { %p1581_p7 = scmp.ne.s32.totalorder %s1855_s10, %s1580_s7  ;;  %s1585_s16 = sshll.u32 %s1705_s9, 4  ;;  %s1586_s16 = int_to_ptr.vmem [resolvable:$false] %s1585_s16 }
  0x49   : > { %s1587_s17 = scalar_lea.vmem %s1586_s16, 256  ;;  %p1588_p5 = scmp.lt.s32.totalorder %s1855_s10, %s1586_s16 }
  0x4a   : > { %p1583_p9 = pnand %p1581_p7, %p1569_p0  ;;  %p1589_p3 = scmp.lt.s32.totalorder %s1587_s17, %s1580_s7 }
  0x4c   : > { %p1584_p13 = pneg %p1583_p9  ;;  %p1590_p4 = por %p1589_p3, %p1588_p5 }
  0x4e   : > { %p1591_p1 = pnand %p1590_p4, %p1584_p13 }
  0x50   : > { %1594 = shalt.err (!%p1591_p1)
}
  0x51   : > { %1432 = dma.hbm_to_vmem [thread:$0]  (!%p1857_p11), %s1853_s8, 128, %s1855_s10, %s214_s13  }
  0x52   : > { %s1295_s14 = sshll.u32 %s1699_s21, 4  ;;  %s234_s29 = scalar_lea.vmem [#allocation6], %s1846_s28 }
  0x53   : > { %s241_s30 = sshll.u32 %s234_s29, 4  ;;  %s239_s16 = scalar_lea.hbm %s2070_s1, %s1295_s14  ;;  %s242_s30 = int_to_ptr.vmem [resolvable:$true] %s241_s30 }
  0x54   : > { %s232_s7 = scalar_lea.sflag [#allocation7], %s231_s12  ;;  %s1595_s17 = scalar_lea.hbm %s239_s16, 16 }
  0x55   : > { %p1596_p4 = scmp.ne.s32.totalorder %s239_s16, %s1595_s17  ;;  %s1600_s8 = scalar_lea.hbm %s2070_s1, 32 }
  0x56   : > { %p1601_p2 = scmp.lt.s32.totalorder %s239_s16, %s2070_s1  ;;  %p1602_p6 = scmp.lt.s32.totalorder %s1600_s8, %s1595_s17 }
  0x57   : > { %p1598_p3 = pnand %p1596_p4, %p1569_p0 }
  0x58   : > { %p1603_p12 = por %p1602_p6, %p1601_p2 }
  0x59   : > { %p1599_p10 = pneg %p1598_p3 }
  0x5b   : > { %p1604_p7 = pnand %p1603_p12, %p1599_p10 }
  0x5d   : > { %1607 = shalt.err (!%p1604_p7)
}
  0x5e   : > { %s1608_s13 = scalar_lea.vmem %s242_s30, 16  ;;  %s1706_s12 = smov [#allocation6]  }
  0x5f   : > { %p1609_p9 = scmp.ne.s32.totalorder %s242_s30, %s1608_s13  ;;  %s1613_s14 = sshll.u32 %s1706_s12, 4  ;;  %s1614_s14 = int_to_ptr.vmem [resolvable:$false] %s1613_s14 }
  0x60   : > { %s1615_s0 = scalar_lea.vmem %s1614_s14, 32  ;;  %p1616_p1 = scmp.lt.s32.totalorder %s242_s30, %s1614_s14 }
  0x61   : > { %p1611_p13 = pnand %p1609_p9, %p1569_p0  ;;  %p1617_p4 = scmp.lt.s32.totalorder %s1615_s0, %s1608_s13 }
  0x63   : > { %p1612_p5 = pneg %p1611_p13  ;;  %p1618_p3 = por %p1617_p4, %p1616_p1 }
  0x65   : > { %p1619_p8 = pnand %p1618_p3, %p1612_p5 }
  0x67   : > { %1622 = shalt.err (!%p1619_p8)
}
  0x68   : > { %1435 = dma.hbm_to_vmem [thread:$0]  (!%p1857_p11), %s239_s16, 16, %s242_s30, %s232_s7  }
  0x69   : > { %p2090_p10 = scmp.ne.s32.totalorder %s2083_s26, 0 }
  0x6a   : > { %s1911_s2 = sand.u32 (!%p2090_p10), 1, %s1691_s19   ;;  %p2091_p0 = scmp.ne.s32.totalorder (!%p2090_p10), %s2081_s24, 0 }
  0x6b   : > { %250 = sbr.rel (%p2090_p10) target bundleno = 2028 (0x7ec), region = 40  ;;  %s1297_s29 = sshll.u32 (!%p2090_p10), %s1911_s2, 3 }
  0x6c   : > { %s253_s6 = scalar_lea.sflag (!%p2090_p10), [#allocation4], %s1911_s2  ;;  %s256_s9 = scalar_lea.vmem (!%p2090_p10), [#allocation3], %s1297_s29 }
  0x70   : > { %1666 = dma.done.wait (%p2091_p0), %s253_s6, 128  }
  0x71   : > { %1668 = vsyncadd (%p2091_p0), %s253_s6, 4294967168  ;;  %s261_s26 = sand.u32 1, %s1776_s22   ;;  %s264_s30 = scalar_lea.vmem [#allocation6], %s1911_s2 }
  0x72   : > { %s262_s11 = scalar_lea.sflag [#allocation7], %s261_s26 }
  0x73   : > { %1670 = dma.done.wait (%p2091_p0), %s262_s11, 16  }
  0x74   : > { %1672 = vsyncadd (%p2091_p0), %s262_s11, 4294967280  ;;  %p2092_p8 = scmp.eq.s32.totalorder %s1776_s22, 0 }
  0x76   : > { %1674 = dma.done.wait (%p2092_p8), [#allocation7], 512   ;;  %p2093_p11 = pmov %p2092_p8 }
  0x77   : > { %p2094_p2 = pmov %p2092_p8 }
  0x78   : > { %1676 = vsyncadd (%p2093_p11), [#allocation7], 4294966784 }
  0x79   : > { %1678 = dma.done.wait (%p2094_p2), [#allocation10], 512   ;;  %p2095_p6 = pmov %p2094_p2 }
  0x7a   : > { %v1707_v0 = vmov 0.0   ;;  %vm1708_vm0 = vmmov 0   ;;  %v307_v1 = vld [vmem:[#allocation8 + $0x18] sm:$0xff]  ;;  %v306_v2 = vld [vmem:[#allocation8 + $0x10] sm:$0xff]  ;;  %v305_v3 = vld [vmem:[#allocation8 + $0x8] sm:$0xff]  ;;  %vm308_vm1 = vcmask 261120   ;;  %v384_v13 = vlaneseq }
  0x7b   : > { %1680 = vsyncadd (%p2095_p6), [#allocation10], 4294966784  ;;  %1346 = vmatprep.subr.mxu0 %v1707_v0  ;;  %1354 = vmatprep.mubr.msk.f32.mxu0 %vm1708_vm0, %v1707_v0  ;;  %v304_v4 = vld [vmem:[#allocation8] sm:$0xff]  ;;  %v303_v5 = vld [vmem:[%s256_s9] sm:$0xff]  ;;  %s1709_s24 = smov 64   ;;  %s1710_s16 = smov 96  }
  0x7c   : > { %1357 = vmatprep.subr.mxu1 %v1707_v0  ;;  %1359 = vmatprep.mubr.msk.f32.mxu1 %vm1708_vm0, %v1707_v0  ;;  %s1711_s7 = smov 88   ;;  %s1712_s17 = smov 120   ;;  %vm399_vm2 = vcmask 64512   ;;  %v382_v14 = vld [vmem:[%s264_s30] sm:$0x1]  ;;  %v385_v15 = vshrl.u32 %v384_v13, 7 }
  0x7d   : > { %1347 = vmatpush3.msra.mxu0 %v307_v1  ;;  %s1713_s8 = smov 80   ;;  %vm383_vm3 = vcmp.eq.f32.partialorder %v382_v14, 0.0  ;;  %v1714_v17 = vmov 0   ;;  %v387_v19 = vand.u32 127, %v384_v13  ;;  %s1715_s10 = smov 72   ;;  %vm733_vm7 = vcmask 130112  }
  0x7e   : > { %1348 = vmatprep.subr.mxu0 %v1707_v0  ;;  %v392_v16 = vsub.s32 0, %v385_v15  ;;  %v389_v18 = vsel %vm383_vm3, 1, %v1714_v17  ;;  %s1716_s28 = smov 112   ;;  %s1717_s13 = smov 104   ;;  %v1081_v17 = vld [vmem:[#allocation9 + $0x8] sm:$0xff]  ;;  %vm905_vm8 = vcmask 195712  }
  0x7f   : > { %1349 = vmatpush3.msra.mxu0 %v306_v2  ;;  %vm388_vm4 = vcmp.gt.s32.totalorder %v387_v19, %v385_v15  ;;  %s1718_s12 = smov 56   ;;  %s1719_s14 = smov 48   ;;  %v1083_v15 = vld [vmem:[#allocation9 + $0x18] sm:$0xff]  ;;  %v1080_v19 = vld [vmem:[#allocation9] sm:$0xff]  ;;  %vm1077_vm9 = vcmask 261312  }
  0x80   : > { %1350 = vmatprep.subr.mxu0 %v1707_v0  ;;  %v393_v20 = vrot.slane %v389_v18, %v392_v16  ;;  %s1720_s0 = smov 40   ;;  %v1082_v16 = vld [vmem:[#allocation9 + $0x10] sm:$0xff]  ;;  %s1721_s6 = smov 8  }
  0x81   : > { %1351 = vmatpush3.msra.mxu0 %v305_v3  ;;  %s1722_s9 = smov 16   ;;  %s1723_s26 = smov 24  }
  0x82   : > { %1352 = vmatprep.subr.mxu0 %v1707_v0  ;;  %vm394_vm5 = vcmp.eq.s32.totalorder %v393_v20, 1  ;;  %p2098_p7 = scmp.ne.s32.totalorder %s2087_s23, 0 }
  0x83   : > { %1353 = vmatpush3.msra.mxu0 %v304_v4  ;;  %vm1966_vm6 = vmor %vm394_vm5, %vm388_vm4 }
  0x84   : > { %1355 = vmatmul.mubr.msk.f32.vlgmr.msra.gmra.mxu0 %vm308_vm1, %v303_v5  ;;  %1377 = vmatprep.subr.mxu0 %v1707_v0 }
  0x85   : > { %1379 = vmatprep.mubr.msk.f32.mxu0 %vm1708_vm0, %v1707_v0 }
 0x144   : > { %v1948_v6 = vpop.f32.mrf.mxu0 }
 0x145   : > { %486 = vrot.lane.b32.xlu1 %v1948_v6, %s1709_s24  ;;  %397 = vrot.lane.b32.xlu0 %v1948_v6, %s1710_s16  ;;  %s1317_s24 = sshll.u32 %s1776_s22, 7  ;;  %s302_s16 = scalar_lea.vmem [#allocation11], %s1297_s29 }
 0x146   : > { %v1356_v7 = vpop.f32.mrf.mxu0  ;;  %s1724_s22 = smov [#allocation11]  }
 0x147   : > { %s1627_s29 = sshll.u32 %s1724_s22, 4  ;;  %s1628_s29 = int_to_ptr.vmem [resolvable:$false] %s1627_s29 }
 0x149   : > { %565 = vrot.lane.b32.xlu1 %v1948_v6, %s1711_s7  ;;  %s1179_s7 = sshll.u32 %s302_s16, 4  ;;  %s1180_s7 = int_to_ptr.vmem [resolvable:$true] %s1179_s7 }
 0x14a   : > { %p1630_p5 = scmp.lt.s32.totalorder %s1180_s7, %s1628_s29 }
 0x14d   : > { %563 = vrot.lane.b32.xlu1 %v1948_v6, %s1712_s17 }
 0x151   : > { %737 = vrot.lane.b32.xlu1 %v1948_v6, %s1713_s8 }
 0x1b7   : > { %v487_v8 = vpop.permute.xlu1 %486  ;;  %v398_v9 = vpop.permute.xlu0 %397 }
 0x1b8   : > { %1358 = vmatpush3.xpose.msk.msra.mxu1 %vm399_vm2, %v398_v9 }
 0x1b9   : > { %1362 = vmatprep.subr.mxu1 %v1707_v0 }
 0x1bb   : > { %v566_v10 = vpop.permute.xlu1 %565  ;;  %1360 = vmatmul.mubr.msk.f32.vlgmr.msra.gmra.mxu1 %vm399_vm2, %v1948_v6 }
 0x1bc   : > { %1363 = vmatpush3.msra.mxu1 %v487_v8  ;;  %1364 = vmatprep.mubr.msk.f32.mxu1 %vm1708_vm0, %v1707_v0 }
 0x1bd   : > { %1367 = vmatprep.subr.mxu1 %v1707_v0 }
 0x1bf   : > { %v564_v11 = vpop.permute.xlu1 %563 }
 0x1c3   : > { %v738_v12 = vpop.permute.xlu1 %737 }
 0x1c4   : > { %1378 = vmatpush3.xpose.msk.msra.mxu0 %vm399_vm2, %v738_v12 }
 0x1c5   : > { %1387 = vmatprep.subr.mxu0 %v1707_v0 }
 0x27b   : > { %v470_v22 = vpop.f32.mrf.mxu1 }
 0x27c   : > { %v474_v23 = vsel %vm1966_vm6, -1e+30, %v470_v22 }
 0x27d   : > { %v1361_v24 = vpop.f32.mrf.mxu1  ;;  %v475_v25 = vsel %vm399_vm2, %v474_v23, -inf }
 0x27e   : > { %476 = vmax.xlane.f32.xlu0 %v475_v25 }
 0x294   : > { %909 = vrot.lane.b32.xlu0 %v1948_v6, %s1715_s10  ;;  %s2031_s10 = scalar_lea.hbm %s2074_s5, %s1317_s24 }
 0x307   : > { %v477_v26 = vpop.xlane.xlu0 %476 }
 0x308   : > { %v478_v27 = vsub.f32 %v474_v23, %v477_v26 }
 0x30a   : > { %v479_v28 = vmul.f32 1.442695, %v478_v27 }
 0x30b   : > { %v910_v33 = vpop.permute.xlu0 %909 }
 0x30c   : > { %1499 = vpow2.f32 %v479_v28  ;;  %v1314_v28 = vld [vmem:[%s2073_s4] ss:$0 sm:$0xff] }
 0x319   : > { %v1500_v29 = vpop.eup %1499 }
 0x31a   : > { %v481_v30 = vsel %vm399_vm2, %v1500_v29, 0.0 }
 0x31b   : > { %482 = vadd.xlane.f32.xlu1 %v481_v30 }
 0x32c   : > { %735 = vrot.lane.b32.xlu1 %v1948_v6, %s1716_s28  ;;  %s1166_s28 = scalar_lea.sflag [#allocation5], %s1911_s2 }
 0x330   : > { %907 = vrot.lane.b32.xlu1 %v1948_v6, %s1717_s13  ;;  %s1623_s13 = scalar_lea.vmem %s1180_s7, 128 }
 0x331   : > { %p1624_p12 = scmp.ne.s32.totalorder %s1180_s7, %s1623_s13 }
 0x333   : > { %p1625_p9 = pnand %p1624_p12, %p2098_p7 }
 0x335   : > { %p1626_p13 = pneg %p1625_p9 }
 0x3a4   : > { %v483_v31 = vpop.xlane.xlu1 %482 }
 0x3a5   : > { %1501 = vrcp.f32 %v483_v31 }
 0x3a8   : > { %v736_v32 = vpop.permute.xlu1 %735 }
 0x3a9   : > { %1380 = vmatmul.mubr.msk.f32.vlgmr.msra.gmra.mxu0 %vm399_vm2, %v736_v32 }
 0x3aa   : > { %1388 = vmatpush3.xpose.msk.msra.mxu0 %vm399_vm2, %v910_v33  ;;  %1389 = vmatprep.mubr.msk.f32.mxu0 %vm1708_vm0, %v1707_v0 }
 0x3ab   : > { %1397 = vmatprep.subr.mxu0 %v1707_v0 }
 0x3ac   : > { %v908_v34 = vpop.permute.xlu1 %907 }
 0x3ad   : > { %1390 = vmatmul.mubr.msk.f32.vlgmr.msra.gmra.mxu0 %vm399_vm2, %v908_v34 }
 0x3ae   : > { %1405 = vmatprep.mubr.msk.f32.mxu0 %vm1708_vm0, %v1707_v0  ;;  %1398 = vmatpush3.msra.mxu0 %v1083_v15 }
 0x3af   : > { %1399 = vmatprep.subr.mxu0 %v1707_v0 }
 0x3b0   : > { %1400 = vmatpush3.msra.mxu0 %v1082_v16 }
 0x3b1   : > { %1401 = vmatprep.subr.mxu0 %v1707_v0 }
 0x3b2   : > { %v1502_v35 = vpop.eup %1501  ;;  %1402 = vmatpush3.msra.mxu0 %v1081_v17 }
 0x3b3   : > { %v485_v36 = vmul.f32 %v1502_v35, %v1500_v29  ;;  %1403 = vmatprep.subr.mxu0 %v1707_v0 }
 0x3b4   : > { %1404 = vmatpush3.msra.mxu0 %v1080_v19 }
 0x3b5   : > { %1365 = vmatmul.mubr.msk.f32.vlgmr.msra.gmra.mxu1 %vm399_vm2, %v485_v36 }
 0x3b6   : > { %1368 = vmatpush3.xpose.msk.msra.mxu1 %vm399_vm2, %v566_v10  ;;  %1369 = vmatprep.mubr.msk.f32.mxu1 %vm1708_vm0, %v1707_v0 }
 0x3b7   : > { %1372 = vmatprep.subr.mxu1 %v1707_v0 }
 0x3b9   : > { %1370 = vmatmul.mubr.msk.f32.vlgmr.msra.gmra.mxu1 %vm399_vm2, %v564_v11 }
 0x3ba   : > { %1374 = vmatprep.mubr.msk.f32.mxu1 %vm1708_vm0, %v1707_v0 }
 0x469   : > { %v809_v37 = vpop.f32.mrf.mxu0 }
 0x46a   : > { %v813_v38 = vsel %vm1966_vm6, -1e+30, %v809_v37 }
 0x46b   : > { %v1381_v39 = vpop.f32.mrf.mxu0  ;;  %v814_v40 = vsel %vm399_vm2, %v813_v38, -inf }
 0x46c   : > { %815 = vmax.xlane.f32.xlu0 %v814_v40 }
 0x46d   : > { %v981_v41 = vpop.f32.mrf.mxu0 }
 0x46e   : > { %v985_v49 = vsel %vm1966_vm6, -1e+30, %v981_v41 }
 0x46f   : > { %v1391_v42 = vpop.f32.mrf.mxu0  ;;  %v986_v50 = vsel %vm399_vm2, %v985_v49, -inf }
 0x475   : > { %v558_v43 = vpop.f32.mrf.mxu1 }
 0x476   : > { %562 = vst.msk [vmem:[#allocation2] sm:$0xff] %vm399_vm2, %v558_v43 }
 0x477   : > { %v1366_v44 = vpop.f32.mrf.mxu1 }
 0x479   : > { %v637_v45 = vpop.f32.mrf.mxu1 }
 0x47a   : > { %v641_v46 = vsel %vm1966_vm6, -1e+30, %v637_v45 }
 0x47b   : > { %v1371_v47 = vpop.f32.mrf.mxu1  ;;  %v642_v48 = vsel %vm399_vm2, %v641_v46, -inf }
 0x47c   : > { %643 = vmax.xlane.f32.xlu1 %v642_v48 }
 0x480   : > { %987 = vmax.xlane.f32.xlu1 %v986_v50 }
 0x4f5   : > { %v816_v51 = vpop.xlane.xlu0 %815 }
 0x4f6   : > { %v817_v52 = vsub.f32 %v813_v38, %v816_v51 }
 0x4f8   : > { %v818_v53 = vmul.f32 1.442695, %v817_v52 }
 0x4fa   : > { %1503 = vpow2.f32 %v818_v53 }
 0x505   : > { %v644_v54 = vpop.xlane.xlu1 %643 }
 0x506   : > { %v645_v62 = vsub.f32 %v641_v46, %v644_v54 }
 0x507   : > { %v1504_v55 = vpop.eup %1503 }
 0x508   : > { %v820_v56 = vsel %vm399_vm2, %v1504_v55, 0.0  ;;  %v646_v63 = vmul.f32 1.442695, %v645_v62 }
 0x509   : > { %821 = vadd.xlane.f32.xlu1 %v820_v56  ;;  %v988_v57 = vpop.xlane.xlu1 %987 }
 0x50a   : > { %v989_v58 = vsub.f32 %v985_v49, %v988_v57 }
 0x50c   : > { %v990_v59 = vmul.f32 1.442695, %v989_v58 }
 0x50e   : > { %1505 = vpow2.f32 %v990_v59 }
 0x50f   : > { %1507 = vpow2.f32 %v646_v63 }
 0x51a   : > { %653 = vrot.lane.b32.xlu1 %v1948_v6, %s1718_s12  ;;  %s1629_s12 = scalar_lea.vmem %s1628_s29, 256 }
 0x51b   : > { %v1506_v60 = vpop.eup %1505  ;;  %p1631_p1 = scmp.lt.s32.totalorder %s1629_s12, %s1623_s13 }
 0x51c   : > { %v992_v61 = vsel %vm399_vm2, %v1506_v60, 0.0  ;;  %v1508_v1 = vpop.eup %1507 }
 0x51d   : > { %993 = vadd.xlane.f32.xlu0 %v992_v61  ;;  %v648_v2 = vsel %vm399_vm2, %v1508_v1, 0.0  ;;  %p1632_p4 = por %p1631_p1, %p1630_p5 }
 0x51f   : > { %p1633_p3 = pnand %p1632_p4, %p1626_p13 }
 0x533   : > { %825 = vrot.lane.b32.xlu0 %v1948_v6, %s1719_s14 }
 0x53e   : > { %649 = vadd.xlane.f32.xlu1 %v648_v2 }
 0x54f   : > { %997 = vrot.lane.b32.xlu1 %v1948_v6, %s1720_s0 }
 0x592   : > { %v822_v3 = vpop.xlane.xlu1 %821 }
 0x596   : > { %v654_v4 = vpop.permute.xlu1 %653 }
 0x597   : > { %1373 = vmatpush3.msra.mxu1 %v654_v4 }
 0x598   : > { %1382 = vmatprep.subr.mxu1 %v1707_v0 }
 0x5a6   : > { %v994_v7 = vpop.xlane.xlu0 %993 }
 0x5aa   : > { %v826_v11 = vpop.permute.xlu0 %825 }
 0x5c7   : > { %v650_v5 = vpop.xlane.xlu1 %649 }
 0x5c8   : > { %1509 = vrcp.f32 %v650_v5 }
 0x5c9   : > { %1511 = vrcp.f32 %v822_v3 }
 0x5ca   : > { %1513 = vrcp.f32 %v994_v7 }
 0x5cb   : > { %v998_v13 = vpop.permute.xlu1 %997 }
 0x5d5   : > { %v1510_v8 = vpop.eup %1509 }
 0x5d6   : > { %v652_v9 = vmul.f32 %v1510_v8, %v1508_v1  ;;  %v1512_v10 = vpop.eup %1511 }
 0x5d7   : > { %v824_v6 = vmul.f32 %v1512_v10, %v1504_v55  ;;  %v1514_v12 = vpop.eup %1513 }
 0x5d8   : > { %1375 = vmatmul.mubr.msk.f32.vlgmr.msra.gmra.mxu1 %vm399_vm2, %v652_v9  ;;  %v996_v14 = vmul.f32 %v1514_v12, %v1506_v60 }
 0x5d9   : > { %1383 = vmatpush3.msra.mxu1 %v826_v11  ;;  %1384 = vmatprep.mubr.msk.f32.mxu1 %vm1708_vm0, %v1707_v0 }
 0x5da   : > { %1392 = vmatprep.subr.mxu1 %v1707_v0 }
 0x5dc   : > { %1385 = vmatmul.mubr.msk.f32.vlgmr.msra.gmra.mxu1 %vm399_vm2, %v824_v6 }
 0x5dd   : > { %1393 = vmatpush3.msra.mxu1 %v998_v13  ;;  %1394 = vmatprep.mubr.msk.f32.mxu1 %vm1708_vm0, %v1707_v0 }
 0x5e0   : > { %1395 = vmatmul.mubr.msk.f32.vlgmr.msra.gmra.mxu1 %vm399_vm2, %v996_v14 }
 0x698   : > { %v725_v18 = vpop.f32.mrf.mxu1 }
 0x699   : > { %730 = vrot.lane.b32.xlu1 %v725_v18, %s1721_s6 }
 0x69a   : > { %v1376_v20 = vpop.f32.mrf.mxu1 }
 0x69c   : > { %v897_v21 = vpop.f32.mrf.mxu1 }
 0x69d   : > { %902 = vrot.lane.b32.xlu0 %v897_v21, %s1722_s9 }
 0x69e   : > { %v1386_v22 = vpop.f32.mrf.mxu1 }
 0x6a0   : > { %v1069_v23 = vpop.f32.mrf.mxu1 }
 0x6a1   : > { %1074 = vrot.lane.b32.xlu1 %v1069_v23, %s1723_s26 }
 0x6a2   : > { %v1396_v24 = vpop.f32.mrf.mxu1 }
 0x70b   : > { %v731_v25 = vpop.permute.xlu1 %730 }
 0x70c   : > { %734 = vst.msk [vmem:[#allocation2] sm:$0xff] %vm733_vm7, %v731_v25 }
 0x70f   : > { %v903_v26 = vpop.permute.xlu0 %902 }
 0x710   : > { %906 = vst.msk [vmem:[#allocation2] sm:$0xff] %vm905_vm8, %v903_v26 }
 0x713   : > { %v1075_v0 = vpop.permute.xlu1 %1074 }
 0x714   : > { %1078 = vst.msk [vmem:[#allocation2] sm:$0xff] %vm1077_vm9, %v1075_v0 }
 0x71b   : > { %v1079_v27 = vld [vmem:[#allocation2] sm:$0xff] }
 0x71c   : > { %1406 = vmatmul.mubr.msk.f32.vlgmr.msra.gmra.mxu0 %vm308_vm1, %v1079_v27 }
 0x7dc   : > { %v1160_v29 = vpop.f32.mrf.mxu0 }
 0x7dd   : > { %v1161_v30 = vadd.f32 %v1314_v28, %v1160_v29 }
 0x7de   : > { %v1407_v31 = vpop.f32.mrf.mxu0 }
 0x7df   : > { %1164 = vst.msk [vmem:[%s302_s16] sm:$0xff] %vm308_vm1, %v1161_v30 }
 0x7e0   : > { %1636 = shalt.err (!%p1633_p3)
}
 0x7e1   : > { %s1637_s14 = scalar_lea.hbm %s2031_s10, 128  ;;  %s1641_s6 = scalar_lea.hbm %s2074_s5, 256 }
 0x7e2   : > { %p1638_p10 = scmp.ne.s32.totalorder %s2031_s10, %s1637_s14  ;;  %p1642_p11 = scmp.lt.s32.totalorder %s2031_s10, %s2074_s5 }
 0x7e3   : > { %p1643_p2 = scmp.lt.s32.totalorder %s1641_s6, %s1637_s14 }
 0x7e4   : > { %p1639_p0 = pnand %p1638_p10, %p2098_p7 }
 0x7e5   : > { %p1644_p6 = por %p1643_p2, %p1642_p11 }
 0x7e6   : > { %p1640_p8 = pneg %p1639_p0 }
 0x7e8   : > { %p1645_p12 = pnand %p1644_p6, %p1640_p8 }
 0x7ea   : > { %1648 = shalt.err (!%p1645_p12)
}
 0x7eb   : > { %1420 = dma.vmem_to_hbm [thread:$0]  (%p2098_p7), %s1180_s7, 128, %s2031_s10, %s1166_s28  }
 0x7ec PF: > { %s1191_s11 = sand.u32 1, %s1687_s18   ;;  %p2099_p9 = scmp.ne.s32.totalorder %s2082_s25, 0 }
 0x7ed   : > { %p2100_p13 = scmp.ge.s32.totalorder %s1699_s21, 2  ;;  %s1192_s30 = scalar_lea.sflag [#allocation5], %s1191_s11 }
 0x7ef   : > { %p1437_p5 = pnand %p2100_p13, %p2099_p9 }
 0x7f1   : > { %p1438_p1 = pneg %p1437_p5 }
 0x7f3   : > { %1682 = dma.done.wait (%p1438_p1), %s1192_s30, 128  }
 0x7f4   : > { %1684 = vsyncadd (%p1438_p1), %s1192_s30, 4294967168  ;;  %p22_p4 = scmp.ge.s32.totalorder %s1827_s15, 4   ;;  %s2101_s18 = smov %s1691_s19 }
 0x7f5   : > { %s2102_s19 = smov %s1695_s20  ;;  %s2103_s20 = smov %s1843_s27 }
 0x7f6   : > { %s2104_s21 = smov %s1827_s15  ;;  %24 = sbr.rel (!%p22_p4) target bundleno = 11 (0xb), region = 106 }
 0x7fb   :  { %1197 = vsyncpa [#allocation4], 1 }
 0x7fc   :  { %1199 = vsyncpa [#allocation4 + $0x1], 1 }
 0x7fd   :  { %1200 = vsyncpa [#allocation7], 1 }
 0x7fe   :  { %1202 = vsyncpa [#allocation7 + $0x1], 1 }
 0x7ff   :  { %1203 = vsyncpa [#allocation10], 1 }
 0x800   :  { %1204 = vsyncpa [#allocation5], 1 }
 0x801   :  { %1206 = vsyncpa [#allocation5 + $0x1], 1 }

</bundles_post_ra>
